<compile_context>
chip_gen: v5e
topology: v5e:2x2
jax: 0.10.0
libtpu: 0.0.40
codegen_flags: <defaults>
</compile_context>

<pallas_src>
import functools

import jax
import jax.numpy as jnp
from jax import lax
from jax.experimental import pallas as pl
from jax.experimental.pallas import tpu as pltpu

LANES = 128     # vreg lane width
STRIP_R = 512   # rows per inner strip: 512x128 f32 = 256 KiB of live temporaries


def _round_up(x, m):
    return (x + m - 1) // m * m


def _chip_defaults():
    """(ncores, max_block_rows) per TPU generation; conservative, correct fallback."""
    try:
        kind = jax.devices()[0].device_kind.lower()
    except Exception:
        kind = ""
    if "v7" in kind or "tpu7" in kind:
        return 2, 8192        # 2 TCs/chip, ~3.2 TB/s per TC -> biggest blocks
    if "v6" in kind:
        return 1, 4096        # 1 TC, 32 MiB scoped-VMEM default
    if "v5e" in kind or "v5 lite" in kind or "v5lite" in kind:
        return 1, 2048        # 1 TC, 16 MiB scoped-VMEM default -> modest blocks
    if "v5p" in kind or "v5" in kind or "v4" in kind:
        return 2, 4096        # megacore chips: shard the parallel axis across both cores
    return 1, 2048


def _focal_bce_sum_kernel(x_ref, t_ref, o_ref, *, block_r, strip_r, steps, rows_total):
    """Accumulate the clamped-BCE sum of this core's row-blocks into a VMEM-resident
    (8, 128) f32 slab (the output block index is constant across the step axis)."""
    c = pl.program_id(0)
    i = pl.program_id(1)

    @pl.when(i == 0)
    def _init():
        o_ref[...] = jnp.zeros_like(o_ref)

    # Valid rows of the logical (rows_total, LANES) array remaining at this block's start.
    # <= 0 for the duplicate "dummy" block a core picks up when nblocks % ncores != 0
    # (its index_map is clamped; every strip below is then skipped -> no double count).
    rows_valid = rows_total - (c * steps + i) * block_r

    def bce(xs, ts):
        xf = xs.astype(jnp.float32)
        tf = ts.astype(jnp.float32)
        # softplus(x) = max(x, 0) + log1p(exp(-|x|));  softplus(-x) = softplus(x) - x.
        # PyTorch binary_cross_entropy(sigmoid(x), t) clamps each log term at -100:
        #   bce = t*min(sp_neg,100) + (1-t)*min(sp_pos,100)
        #       = min(sp_pos,100) + t*(min(sp_neg,100) - min(sp_pos,100))   # fewer VALU ops
        sp_pos = jnp.maximum(xf, 0.0) + jnp.log1p(jnp.exp(-jnp.abs(xf)))
        sp_neg = sp_pos - xf
        m_pos = jnp.minimum(sp_pos, 100.0)
        m_neg = jnp.minimum(sp_neg, 100.0)
        return m_pos + tf * (m_neg - m_pos)

    def fold(vals):
        # (strip_r, 128) -> (8, 128) with pure vreg (VPU) adds; no XLU, no SMEM traffic.
        o_ref[...] += jnp.sum(vals.reshape(strip_r // 8, 8, LANES), axis=0)

    def strip(s):
        start = s * strip_r
        if not isinstance(start, int):
            start = pl.multiple_of(start, strip_r)
        rows_left = rows_valid - s * strip_r

        @pl.when(rows_left >= strip_r)          # hot path: fully-valid strip, no masking
        def _full():
            fold(bce(x_ref[pl.ds(start, strip_r), :], t_ref[pl.ds(start, strip_r), :]))

        @pl.when(jnp.logical_and(rows_left > 0, rows_left < strip_r))   # last partial strip
        def _partial():
            v = bce(x_ref[pl.ds(start, strip_r), :], t_ref[pl.ds(start, strip_r), :])
            row = lax.broadcasted_iota(jnp.int32, (strip_r, 1), 0)
            fold(jnp.where(row < rows_left, v, 0.0))

    nstrips = block_r // strip_r
    if nstrips == 1:
        strip(0)
    else:
        def body(s, carry):
            strip(s)
            return carry
        lax.fori_loop(0, nstrips, body, 0, unroll=2)


def focal_loss(inputs, targets, alpha=0.8, gamma=2):
    """Matches FocalLoss().forward(inputs, targets): sigmoid + mean BCE + focal transform."""
    x = jnp.asarray(inputs).reshape(-1)
    t = jnp.asarray(targets).reshape(-1)
    if not jnp.issubdtype(x.dtype, jnp.floating):
        x = x.astype(jnp.float32)
    if not jnp.issubdtype(t.dtype, jnp.floating):
        t = t.astype(x.dtype)   # integer/bool masks: stream at (or below) the logits' width
    # NOTE: for strictly-binary float targets, downcasting t to bfloat16 here would cut HBM
    # traffic ~25% with identical results; left off so soft labels stay bit-exact.
    n = int(x.size)

    ncores, max_block_r = _chip_defaults()

    # ---- Lay the flat stream out as (rows_total, LANES); zero-copy in the aligned case ----
    rows_total = -(-n // LANES)
    rows_padded = max(rows_total, 8)            # at least one (8, 128) tile
    padded_n = rows_padded * LANES
    if padded_n != n:
        # Rare path (n % 128 != 0, or tiny n): pad with BCE-neutral values (x = finite min,
        # t = 0  ->  bce == 0 exactly).  This is the only case that materializes a copy.
        pad = padded_n - n
        x = jnp.pad(x, (0, pad), constant_values=float(jnp.finfo(x.dtype).min))
        t = jnp.pad(t, (0, pad))
        rows_total = rows_padded
    x2 = x.reshape(rows_total, LANES)
    t2 = t.reshape(rows_total, LANES)

    # ---- Block / grid selection -----------------------------------------------------------
    rows_cap = max(8, (rows_total // 8) * 8)            # keep block_r <= rows_total
    per_core = -(-rows_total // ncores)
    block_r = min(max_block_r, _round_up(per_core, 8), rows_cap)
    strip_r = min(STRIP_R, block_r)
    if block_r % strip_r:
        block_r = (block_r // strip_r) * strip_r        # multiple of strip_r, still <= caps
    nblocks = -(-rows_total // block_r)
    steps = -(-nblocks // ncores)

    in_map = lambda c, i: (jnp.minimum(c * steps + i, nblocks - 1), 0)

    kernel = functools.partial(
        _focal_bce_sum_kernel,
        block_r=block_r, strip_r=strip_r, steps=steps, rows_total=rows_total)

    partials = pl.pallas_call(
        kernel,
        out_shape=jax.ShapeDtypeStruct((ncores, 8, LANES), jnp.float32),
        grid_spec=pltpu.PrefetchScalarGridSpec(
            num_scalar_prefetch=0,
            grid=(ncores, steps),
            in_specs=[
                pl.BlockSpec((block_r, LANES), in_map),
                pl.BlockSpec((block_r, LANES), in_map),
            ],
            out_specs=pl.BlockSpec((None, 8, LANES), lambda c, i: (c, 0, 0)),
        ),
        compiler_params=pltpu.CompilerParams(
            dimension_semantics=("parallel", "arbitrary"),
        ),
    )(x2, t2)

    # O(1) epilogue in the wrapper: combine per-core partials + focal transform
    # (keeps the two TensorCores from ever synchronizing inside the kernel).
    mean_bce = jnp.sum(partials) * jnp.float32(1.0 / n)
    one_minus = 1.0 - jnp.exp(-mean_bce)
    g = float(gamma)
    if g == int(g) and 0 <= int(g) <= 8:
        pw = jnp.float32(1.0)
        for _ in range(int(g)):                  # integer gamma: multiply chain, no pow
            pw = pw * one_minus
    else:
        pw = one_minus ** jnp.float32(gamma)
    return jnp.float32(alpha) * pw * mean_bce


def _focal_loss_ref(inputs, targets, alpha=0.8, gamma=2):
    # Pure-JAX reference with the same clamped BCE-from-logits formulation
    # (identical to PyTorch's sigmoid + binary_cross_entropy for this input range).
    x = inputs.reshape(-1).astype(jnp.float32)
    t = targets.reshape(-1).astype(jnp.float32)
    sp_pos = jax.nn.softplus(x)
    sp_neg = sp_pos - x
    bce = jnp.mean(t * jnp.minimum(sp_neg, 100.0)
                   + (1.0 - t) * jnp.minimum(sp_pos, 100.0))
    return alpha * (1.0 - jnp.exp(-bce)) ** gamma * bce


if __name__ == "__main__":
    key = jax.random.PRNGKey(0)
    k1, k2, k3, k4 = jax.random.split(key, 4)

    # Primary check: NCHW-shaped logits/targets like PyTorch conv outputs.
    x = jax.random.normal(k1, (2, 4, 16, 16), dtype=jnp.float32)
    t = (jax.random.uniform(k2, (2, 4, 16, 16)) > 0.5).astype(jnp.float32)
    loss = focal_loss(x, t, alpha=0.8, gamma=2)
    jax.block_until_ready(loss)
    ref = _focal_loss_ref(x, t, alpha=0.8, gamma=2)
    assert jnp.allclose(loss, ref, rtol=2e-5, atol=1e-6), (loss, ref)

    # Unaligned element count (exercises the neutral-pad + masked partial-block path).
    xo = jax.random.normal(k3, (3, 5, 7, 11), dtype=jnp.float32)
    to = (jax.random.uniform(k4, (3, 5, 7, 11)) > 0.5).astype(jnp.float32)
    loss_o = focal_loss(xo, to, alpha=0.8, gamma=2)
    ref_o = _focal_loss_ref(xo, to, alpha=0.8, gamma=2)
    assert jnp.allclose(loss_o, ref_o, rtol=2e-5, atol=1e-6), (loss_o, ref_o)

    # Larger input (exercises the inner strip fori_loop inside a multi-strip block).
    xl = jax.random.normal(k1, (8, 8, 64, 64), dtype=jnp.float32)
    tl = (jax.random.uniform(k2, (8, 8, 64, 64)) > 0.5).astype(jnp.float32)
    loss_l = focal_loss(xl, tl, alpha=0.8, gamma=2)
    ref_l = _focal_loss_ref(xl, tl, alpha=0.8, gamma=2)
    assert jnp.allclose(loss_l, ref_l, rtol=1e-4, atol=1e-6), (loss_l, ref_l)

    print("KERNEL_OK")
</pallas_src>

<mosaic_0001>
module attributes {stable_mosaic.version = 11 : i64} {
  func.func @_focal_bce_sum_kernel(%arg0: i32, %arg1: i32, %arg2: memref<16x128xf32, #tpu.memory_space<vmem>>, %arg3: memref<16x128xf32, #tpu.memory_space<vmem>>, %arg4: memref<1x8x128xf32, #tpu.memory_space<vmem>>) attributes {dimension_semantics = [#tpu.dimension_semantics<parallel>, #tpu.dimension_semantics<arbitrary>], iteration_bounds = array<i64: 1, 1>, scalar_prefetch = 0 : i64, scratch_operands = 0 : i64, tpu.core_type = #tpu.core_type<tc>, window_params = [{transform_indices = @transform_0, window_bounds = array<i64: 16, 128>}, {transform_indices = @transform_1, window_bounds = array<i64: 16, 128>}, {transform_indices = @transform_2, window_bounds = array<i64: 1, 8, 128>}]} {
    %c0_i32 = arith.constant 0 : i32
    %0 = arith.cmpi eq, %arg1, %c0_i32 : i32
    %1 = arith.extui %0 : i1 to i32
    %c0_i32_0 = arith.constant 0 : i32
    %2 = arith.cmpi ne, %1, %c0_i32_0 : i32
    scf.if %2 {
      %cst = arith.constant 0.000000e+00 : f32
      %16 = vector.broadcast %cst : f32 to vector<8x128xf32>
      %c0 = arith.constant 0 : index
      %c0_8 = arith.constant 0 : index
      %c0_9 = arith.constant 0 : index
      %17 = vector.load %arg4[%c0, %c0_8, %c0_9] : memref<1x8x128xf32, #tpu.memory_space<vmem>>, vector<1x8x128xf32>
      %18 = vector.shape_cast %17 : vector<1x8x128xf32> to vector<8x128xf32>
      %19 = vector.shape_cast %16 : vector<8x128xf32> to vector<1x8x128xf32>
      tpu.vector_store %arg4[%c0, %c0_8, %c0_9], %19 {strides = array<i32>} : memref<1x8x128xf32, #tpu.memory_space<vmem>>, vector<1x8x128xf32>,
    } else {
    }
    %c1_i32 = arith.constant 1 : i32
    %3 = arith.muli %arg0, %c1_i32 : i32
    %4 = arith.addi %3, %arg1 : i32
    %c16_i32 = arith.constant 16 : i32
    %5 = arith.muli %4, %c16_i32 : i32
    %c16_i32_1 = arith.constant 16 : i32
    %6 = arith.subi %c16_i32_1, %5 : i32
    %c0_i32_2 = arith.constant 0 : i32
    %7 = arith.subi %6, %c0_i32_2 : i32
    %c16_i32_3 = arith.constant 16 : i32
    %8 = arith.cmpi sge, %7, %c16_i32_3 : i32
    %9 = arith.extui %8 : i1 to i32
    %c0_i32_4 = arith.constant 0 : i32
    %10 = arith.cmpi ne, %9, %c0_i32_4 : i32
    scf.if %10 {
      %c0 = arith.constant 0 : index
      %c0_8 = arith.constant 0 : index
      %16 = vector.load %arg2[%c0, %c0_8] : memref<16x128xf32, #tpu.memory_space<vmem>>, vector<16x128xf32>
      %c0_9 = arith.constant 0 : index
      %c0_10 = arith.constant 0 : index
      %17 = vector.load %arg3[%c0_9, %c0_10] : memref<16x128xf32, #tpu.memory_space<vmem>>, vector<16x128xf32>
      %cst = arith.constant 0.000000e+00 : f32
      %18 = vector.broadcast %cst : f32 to vector<16x128xf32>
      %19 = arith.maximumf %16, %18 : vector<16x128xf32>
      %20 = math.absf %16 : vector<16x128xf32>
      %cst_11 = arith.constant 0.000000e+00 : f32
      %21 = vector.broadcast %cst_11 : f32 to vector<16x128xf32>
      %22 = arith.subf %21, %20 : vector<16x128xf32>
      %23 = math.exp %22 : vector<16x128xf32>
      %24 = math.log1p %23 : vector<16x128xf32>
      %25 = arith.addf %19, %24 : vector<16x128xf32>
      %26 = arith.subf %25, %16 : vector<16x128xf32>
      %cst_12 = arith.constant 1.000000e+02 : f32
      %27 = vector.broadcast %cst_12 : f32 to vector<16x128xf32>
      %28 = arith.minimumf %25, %27 : vector<16x128xf32>
      %cst_13 = arith.constant 1.000000e+02 : f32
      %29 = vector.broadcast %cst_13 : f32 to vector<16x128xf32>
      %30 = arith.minimumf %26, %29 : vector<16x128xf32>
      %31 = arith.subf %30, %28 : vector<16x128xf32>
      %32 = arith.mulf %17, %31 : vector<16x128xf32>
      %33 = arith.addf %28, %32 : vector<16x128xf32>
      %c0_14 = arith.constant 0 : index
      %c0_15 = arith.constant 0 : index
      %c0_16 = arith.constant 0 : index
      %34 = vector.load %arg4[%c0_14, %c0_15, %c0_16] : memref<1x8x128xf32, #tpu.memory_space<vmem>>, vector<1x8x128xf32>
      %35 = vector.shape_cast %34 : vector<1x8x128xf32> to vector<8x128xf32>
      %36 = vector.shape_cast %33 : vector<16x128xf32> to vector<2x8x128xf32>
      %cst_17 = arith.constant dense<0.000000e+00> : vector<8x128xf32>
      %37 = vector.multi_reduction <add>, %36, %cst_17 [0] : vector<2x8x128xf32> to vector<8x128xf32>
      %38 = arith.addf %35, %37 : vector<8x128xf32>
      %c0_18 = arith.constant 0 : index
      %c0_19 = arith.constant 0 : index
      %c0_20 = arith.constant 0 : index
      %39 = vector.load %arg4[%c0_18, %c0_19, %c0_20] : memref<1x8x128xf32, #tpu.memory_space<vmem>>, vector<1x8x128xf32>
      %40 = vector.shape_cast %39 : vector<1x8x128xf32> to vector<8x128xf32>
      %41 = vector.shape_cast %38 : vector<8x128xf32> to vector<1x8x128xf32>
      tpu.vector_store %arg4[%c0_18, %c0_19, %c0_20], %41 {strides = array<i32>} : memref<1x8x128xf32, #tpu.memory_space<vmem>>, vector<1x8x128xf32>,
    } else {
    }
    %c0_i32_5 = arith.constant 0 : i32
    %11 = arith.cmpi sgt, %7, %c0_i32_5 : i32
    %c16_i32_6 = arith.constant 16 : i32
    %12 = arith.cmpi slt, %7, %c16_i32_6 : i32
    %13 = arith.andi %11, %12 : i1
    %14 = arith.extui %13 : i1 to i32
    %c0_i32_7 = arith.constant 0 : i32
    %15 = arith.cmpi ne, %14, %c0_i32_7 : i32
    scf.if %15 {
      %c0 = arith.constant 0 : index
      %c0_8 = arith.constant 0 : index
      %16 = vector.load %arg2[%c0, %c0_8] : memref<16x128xf32, #tpu.memory_space<vmem>>, vector<16x128xf32>
      %c0_9 = arith.constant 0 : index
      %c0_10 = arith.constant 0 : index
      %17 = vector.load %arg3[%c0_9, %c0_10] : memref<16x128xf32, #tpu.memory_space<vmem>>, vector<16x128xf32>
      %cst = arith.constant 0.000000e+00 : f32
      %18 = vector.broadcast %cst : f32 to vector<16x128xf32>
      %19 = arith.maximumf %16, %18 : vector<16x128xf32>
      %20 = math.absf %16 : vector<16x128xf32>
      %cst_11 = arith.constant 0.000000e+00 : f32
      %21 = vector.broadcast %cst_11 : f32 to vector<16x128xf32>
      %22 = arith.subf %21, %20 : vector<16x128xf32>
      %23 = math.exp %22 : vector<16x128xf32>
      %24 = math.log1p %23 : vector<16x128xf32>
      %25 = arith.addf %19, %24 : vector<16x128xf32>
      %26 = arith.subf %25, %16 : vector<16x128xf32>
      %cst_12 = arith.constant 1.000000e+02 : f32
      %27 = vector.broadcast %cst_12 : f32 to vector<16x128xf32>
      %28 = arith.minimumf %25, %27 : vector<16x128xf32>
      %cst_13 = arith.constant 1.000000e+02 : f32
      %29 = vector.broadcast %cst_13 : f32 to vector<16x128xf32>
      %30 = arith.minimumf %26, %29 : vector<16x128xf32>
      %31 = arith.subf %30, %28 : vector<16x128xf32>
      %32 = arith.mulf %17, %31 : vector<16x128xf32>
      %33 = arith.addf %28, %32 : vector<16x128xf32>
      %34 = tpu.iota {dimensions = array<i32: 0>} : vector<16x1xi32>
      %35 = vector.broadcast %7 : i32 to vector<16x1xi32>
      %36 = arith.cmpi slt, %34, %35 : vector<16x1xi32>
      %cst_14 = arith.constant 0.000000e+00 : f32
      %37 = vector.shape_cast %36 : vector<16x1xi1> to vector<16x1xi1>
      %38 = vector.broadcast %37 : vector<16x1xi1> to vector<16x128xi1>
      %39 = vector.broadcast %cst_14 : f32 to vector<16x128xf32>
      %40 = arith.select %38, %33, %39 : vector<16x128xi1>, vector<16x128xf32>
      %c0_15 = arith.constant 0 : index
      %c0_16 = arith.constant 0 : index
      %c0_17 = arith.constant 0 : index
      %41 = vector.load %arg4[%c0_15, %c0_16, %c0_17] : memref<1x8x128xf32, #tpu.memory_space<vmem>>, vector<1x8x128xf32>
      %42 = vector.shape_cast %41 : vector<1x8x128xf32> to vector<8x128xf32>
      %43 = vector.shape_cast %40 : vector<16x128xf32> to vector<2x8x128xf32>
      %cst_18 = arith.constant dense<0.000000e+00> : vector<8x128xf32>
      %44 = vector.multi_reduction <add>, %43, %cst_18 [0] : vector<2x8x128xf32> to vector<8x128xf32>
      %45 = arith.addf %42, %44 : vector<8x128xf32>
      %c0_19 = arith.constant 0 : index
      %c0_20 = arith.constant 0 : index
      %c0_21 = arith.constant 0 : index
      %46 = vector.load %arg4[%c0_19, %c0_20, %c0_21] : memref<1x8x128xf32, #tpu.memory_space<vmem>>, vector<1x8x128xf32>
      %47 = vector.shape_cast %46 : vector<1x8x128xf32> to vector<8x128xf32>
      %48 = vector.shape_cast %45 : vector<8x128xf32> to vector<1x8x128xf32>
      tpu.vector_store %arg4[%c0_19, %c0_20, %c0_21], %48 {strides = array<i32>} : memref<1x8x128xf32, #tpu.memory_space<vmem>>, vector<1x8x128xf32>,
    } else {
    }
    return
  }
  func.func @transform_0(%arg0: i32, %arg1: i32) -> (i32, i32) {
    %c1_i32 = arith.constant 1 : i32
    %0 = arith.muli %arg0, %c1_i32 : i32
    %1 = arith.addi %0, %arg1 : i32
    %c0_i32 = arith.constant 0 : i32
    %2 = arith.minsi %1, %c0_i32 : i32
    %c0_i32_0 = arith.constant 0 : i32
    %c0_i32_1 = arith.constant 0 : i32
    return %2, %c0_i32_0 : i32, i32
  }
  func.func @transform_1(%arg0: i32, %arg1: i32) -> (i32, i32) {
    %c1_i32 = arith.constant 1 : i32
    %0 = arith.muli %arg0, %c1_i32 : i32
    %1 = arith.addi %0, %arg1 : i32
    %c0_i32 = arith.constant 0 : i32
    %2 = arith.minsi %1, %c0_i32 : i32
    %c0_i32_0 = arith.constant 0 : i32
    %c0_i32_1 = arith.constant 0 : i32
    return %2, %c0_i32_0 : i32, i32
  }
  func.func @transform_2(%arg0: i32, %arg1: i32) -> (i32, i32, i32) {
    %c0_i32 = arith.constant 0 : i32
    %c0_i32_0 = arith.constant 0 : i32
    %c0_i32_1 = arith.constant 0 : i32
    return %arg0, %c0_i32, %c0_i32_0 : i32, i32, i32
  }
}

</mosaic_0001>

<bundles_post_ra>
// kernel: tpu_custom_call.1
= control target key start
LH: loop header
LB: loop body
LE: loop exit
PB: predicated region body
PF: predicated region fallthrough
CT: control target
= control target key end

     0   :  { %7 = vsyncpa [#allocation3], 0  ;;  %s337_s0 = inlined_call_operand.hbm [shape: f32[16,128], index: 0, kind: input, shape index: {}]   ;;  %s338_s1 = inlined_call_operand.hbm [shape: f32[16,128], index: 1, kind: input, shape index: {}]   ;;  %s339_s2 = inlined_call_operand.hbm [shape: f32[1,8,128], index: 2, kind: output, shape index: {}]  }
   0x1   :  { %8 = vsyncpa [#allocation6], 0 }
   0x2   :  { %9 = vsyncpa [#allocation4], 0  ;;  %s20_s11 = sshll.u32 %s337_s0, 4  ;;  %s308_s12 = smov [#allocation2]   ;;  %s21_s11 = int_to_ptr.hbm [resolvable:$true] %s20_s11 }
   0x3   :  { %s22_s13 = sshll.u32 %s308_s12, 4  ;;  %s39_s16 = sshll.u32 %s338_s1, 4  ;;  %s23_s13 = int_to_ptr.vmem [resolvable:$true] %s22_s13  ;;  %s40_s16 = int_to_ptr.hbm [resolvable:$true] %s39_s16 }
   0x4   :  { %s309_s17 = smov 128   ;;  %s310_s18 = smov 8  }
   0x5   :  { %28 = dma.hbm_to_vmem [thread:$0]  %s21_s11, 256, %s23_s13, [#allocation3], %s309_s17, %s309_s17, %s310_s18  }
   0x6   :  { %s311_s19 = smov [#allocation5]  }
   0x7   :  { %s41_s20 = sshll.u32 %s311_s19, 4  ;;  %s42_s20 = int_to_ptr.vmem [resolvable:$true] %s41_s20 }
   0x8   :  { %47 = dma.hbm_to_vmem [thread:$0]  %s40_s16, 256, %s42_s20, [#allocation6], %s309_s17, %s309_s17, %s310_s18  }
   0x9   :  { %302 = dma.done.wait [#allocation3], 256  }
   0xa   :  { %303 = vsyncadd [#allocation3], 4294967040 }
   0xb   :  { %304 = dma.done.wait [#allocation6], 256  }
   0xc   :  { %305 = vsyncadd [#allocation6], 4294967040  ;;  %v76_v0 = vld [vmem:[#allocation2] sm:$0xff]  ;;  %v77_v1 = vld [vmem:[#allocation2 + $0x8] sm:$0xff]  ;;  %s312_s0 = smov [#allocation7]   ;;  %s201_s23 = sshll.u32 %s339_s2, 4  ;;  %s202_s23 = int_to_ptr.hbm [resolvable:$true] %s201_s23 }
   0xd   :  { %v82_v2 = vand.u32 2147483647, %v76_v0  ;;  %v83_v3 = vand.u32 2147483647, %v77_v1  ;;  %v80_v20 = vmax.f32 %v76_v0, 0.0  ;;  %v81_v23 = vmax.f32 %v77_v1, 0.0 }
   0xe   :  { %v78_v35 = vld [vmem:[#allocation5] sm:$0xff]  ;;  %v79_v37 = vld [vmem:[#allocation5 + $0x8] sm:$0xff]  ;;  %s199_s1 = sshll.u32 %s312_s0, 4  ;;  %s200_s1 = int_to_ptr.vmem [resolvable:$true] %s199_s1 }
   0xf   :  { %v84_v4 = vsub.f32 0.0, %v82_v2  ;;  %v85_v5 = vsub.f32 0.0, %v83_v3 }
  0x11   :  { %v86_v6 = vmul.f32 1.442695, %v84_v4  ;;  %v88_v7 = vmul.f32 1.442695, %v85_v5 }
  0x13   :  { %222 = vpow2.f32 %v86_v6 }
  0x14   :  { %224 = vpow2.f32 %v88_v7 }
  0x19   :  { %v223_v8 = vpop.eup %222 }
  0x1a   :  { %v225_v9 = vpop.eup %224  ;;  %v90_v10 = vadd.f32 1.0, %v223_v8  ;;  %v93_v11 = vmul.f32 -0.5, %v223_v8  ;;  %v96_v15 = vand.u32 2147483647, %v223_v8 }
  0x1b   :  { %v99_v12 = vadd.f32 1.0, %v225_v9  ;;  %v102_v13 = vmul.f32 -0.5, %v225_v9  ;;  %v105_v17 = vand.u32 2147483647, %v225_v9 }
  0x1c   :  { %226 = vlog2.f32 %v90_v10  ;;  %v94_v14 = vadd.f32 1.0, %v93_v11  ;;  %vm97_vm0 = vcmp.lt.f32.partialorder %v96_v15, 0.0004427343 }
  0x1d   :  { %228 = vlog2.f32 %v99_v12  ;;  %v103_v16 = vadd.f32 1.0, %v102_v13  ;;  %vm106_vm1 = vcmp.lt.f32.partialorder %v105_v17, 0.0004427343 }
  0x1e   :  { %v95_v18 = vmul.f32 %v223_v8, %v94_v14 }
  0x1f   :  { %v104_v21 = vmul.f32 %v225_v9, %v103_v16 }
  0x22   :  { %v227_v19 = vpop.eup %226 }
  0x23   :  { %v229_v22 = vpop.eup %228  ;;  %v92_v24 = vmul.f32 0.6931472, %v227_v19 }
  0x24   :  { %v101_v25 = vmul.f32 0.6931472, %v229_v22 }
  0x25   :  { %v98_v26 = vsel %vm97_vm0, %v95_v18, %v92_v24 }
  0x26   :  { %v107_v27 = vsel %vm106_vm1, %v104_v21, %v101_v25  ;;  %v108_v28 = vadd.f32 %v98_v26, %v80_v20 }
  0x27   :  { %v109_v29 = vadd.f32 %v107_v27, %v81_v23 }
  0x28   :  { %v110_v30 = vsub.f32 %v108_v28, %v76_v0  ;;  %v112_v31 = vmin.f32 %v108_v28, 100.0 }
  0x29   :  { %v111_v32 = vsub.f32 %v109_v29, %v77_v1  ;;  %v113_v33 = vmin.f32 %v109_v29, 100.0 }
  0x2a   :  { %v114_v34 = vmin.f32 %v110_v30, 100.0 }
  0x2b   :  { %v115_v36 = vmin.f32 %v111_v32, 100.0 }
  0x2c   :  { %v116_v38 = vsub.f32 %v114_v34, %v112_v31 }
  0x2d   :  { %v117_v39 = vsub.f32 %v115_v36, %v113_v33 }
  0x2e   :  { %v118_v40 = vmul.f32 %v116_v38, %v78_v35 }
  0x2f   :  { %v119_v41 = vmul.f32 %v117_v39, %v79_v37 }
  0x30   :  { %v120_v42 = vadd.f32 %v118_v40, %v112_v31 }
  0x31   :  { %v121_v43 = vadd.f32 %v119_v41, %v113_v33 }
  0x33   :  { %v123_v44 = vadd.f32 %v121_v43, %v120_v42 }
  0x35   :  { %125 = vst [vmem:[#allocation7] sm:$0xff] %v123_v44 }
  0x36   :  { %204 = dma.vmem_to_hbm [thread:$0]  %s200_s1, 128, %s202_s23, [#allocation4]  }
  0x37   :  { %306 = dma.done.wait [#allocation4], 128  }
  0x38   :  { %307 = vsyncadd [#allocation4], 4294967168 }
  0x39   :  { %209 = vsyncpa [#allocation3], 1 }
  0x3a   :  { %210 = vsyncpa [#allocation6], 1 }
  0x3b   :  { %211 = vsyncpa [#allocation4], 1 }

</bundles_post_ra>
